<compile_context>
chip_gen: v6e
topology: v6e:2x2x1
jax: 0.10.0
libtpu: 0.0.40
codegen_flags: <defaults>
</compile_context>

<pallas_src>
import functools

import numpy as np
import jax
import jax.numpy as jnp
from jax.experimental import pallas as pl
from jax.experimental.pallas import tpu as pltpu

try:  # prefer scipy's Hungarian if present
    from scipy.optimize import linear_sum_assignment as _scipy_lsa  # type: ignore
except Exception:  # pragma: no cover
    _scipy_lsa = None


def _round_up(x, m):
    return ((x + m - 1) // m) * m


# -----------------------------------------------------------------------------
# Pallas kernel: per-image pairwise matching-cost tile
#   logits_ref : (tQ, C)   f32
#   boxes_ref  : (tQ, 8)   f32  cols 0..3 = |w_bbox|-scaled f32 coords (L1 term)
#                               cols 4..7 = f16-roundtripped coords (GIoU term)
#   tgt_ref    : (8,  T)   f32  rows 0..3 scaled f32, rows 4..7 f16-roundtripped
#   onehot_ref : (C,  T)   f32  (-w_class) * onehot(labels); zero in padded lanes
#   c_ref      : (tQ, T)   f32
# -----------------------------------------------------------------------------
def _cost_kernel(bbox_sign, w_giou,
                 logits_ref, boxes_ref, tgt_ref, onehot_ref, c_ref):
    logits = logits_ref[...]
    boxes = boxes_ref[...]
    tgt = tgt_ref[...]
    onehot = onehot_ref[...]

    # ---- cost_bbox: L1 cdist; coords were pre-scaled by |w_bbox| ------------
    cb = jnp.abs(boxes[:, 0:1] - tgt[0:1, :])
    for k in range(1, 4):
        cb = cb + jnp.abs(boxes[:, k:k + 1] - tgt[k:k + 1, :])
    if bbox_sign < 0:            # static trace-time branch (w_bbox < 0 is unusual)
        cb = -cb

    # ---- cost_class: -(w_class) * softmax(logits)[:, tgt_ids] ---------------
    # Weight & sign live in the precomputed one-hot; the softmax denominator is
    # an approx (EUP) reciprocal folded into `e` *before* the tiny matmul, so no
    # (tQ,T)-wide VPU pass is spent on the class term.
    m = jnp.max(logits, axis=-1, keepdims=True)
    e = jnp.exp(logits - m)                                        # (tQ, C)
    inv_denom = pl.reciprocal(jnp.sum(e, axis=-1, keepdims=True), approx=True)
    cc = jnp.dot(e * inv_denom, onehot, preferred_element_type=jnp.float32)

    # ---- cost_giou on the f16-quantized coordinates -------------------------
    o_x0 = boxes[:, 4:5] - 0.5 * boxes[:, 6:7]
    o_y0 = boxes[:, 5:6] - 0.5 * boxes[:, 7:8]
    o_x1 = boxes[:, 4:5] + 0.5 * boxes[:, 6:7]
    o_y1 = boxes[:, 5:6] + 0.5 * boxes[:, 7:8]
    t_x0 = tgt[4:5, :] - 0.5 * tgt[6:7, :]
    t_y0 = tgt[5:6, :] - 0.5 * tgt[7:8, :]
    t_x1 = tgt[4:5, :] + 0.5 * tgt[6:7, :]
    t_y1 = tgt[5:6, :] + 0.5 * tgt[7:8, :]

    area_o = (o_x1 - o_x0) * (o_y1 - o_y0)                         # (tQ, 1)
    area_t = (t_x1 - t_x0) * (t_y1 - t_y0)                         # (1,  T)

    inter_w = jnp.maximum(jnp.minimum(o_x1, t_x1) - jnp.maximum(o_x0, t_x0), 0.0)
    inter_h = jnp.maximum(jnp.minimum(o_y1, t_y1) - jnp.maximum(o_y0, t_y0), 0.0)
    inter = inter_w * inter_h                                      # (tQ, T)
    union = area_o + area_t - inter
    iou = inter * pl.reciprocal(union, approx=True)                # EUP slot

    enc = ((jnp.maximum(o_x1, t_x1) - jnp.minimum(o_x0, t_x0)) *
           (jnp.maximum(o_y1, t_y1) - jnp.minimum(o_y0, t_y0)))
    giou = iou - (enc - union) * pl.reciprocal(enc, approx=True)   # EUP slot

    # cb already carries w_bbox, cc already carries -w_class.
    c_ref[...] = (cb + cc - w_giou * giou).astype(c_ref.dtype)


# -----------------------------------------------------------------------------
# Wrapper: block-diagonal (per-image) cost matrix, padded & tiled for the TPU
# -----------------------------------------------------------------------------
def compute_cost_matrix(pred_logits, pred_boxes, tgt_boxes_list, tgt_labels_list,
                        cost_class=1.0, cost_bbox=1.0, cost_giou=1.0):
    """Returns (bs, nq_pad, t_pad) f32 costs; valid region is [:, :nq, :sizes[i]]."""
    bs, nq, num_classes = pred_logits.shape
    sizes = [int(b.shape[0]) for b in tgt_boxes_list]
    t_max = max(sizes) if sizes else 0
    t_pad = _round_up(max(t_max, 1), 128)          # lane-dense output axis

    # ---- query-axis tiling: as few / as fat tiles as possible (<=1024 rows) --
    nq_r = _round_up(nq, 8)

    def _tile_for(cap):
        n_tiles = -(-nq_r // cap)
        return _round_up(-(-nq_r // n_tiles), 8)

    tile_q = _tile_for(1024)

    def _est_vmem(tq):     # double-buffered f32 in/out blocks
        return 2 * 4 * (tq * num_classes + tq * 8 +
                        num_classes * t_pad + 8 * t_pad + tq * t_pad)

    # Stay well under v5e's 16 MiB default scoped-VMEM limit (v6e/v7x have more).
    while _est_vmem(tile_q) > 8 * 1024 * 1024 and tile_q > 8:
        tile_q = _tile_for(max(8, tile_q // 2))
    # v7x has 2 TensorCores per chip: guarantee >=2 grid steps to keep both busy.
    if bs * (-(-nq_r // tile_q)) < 2 and tile_q > 8:
        tile_q = _tile_for(max(8, (tile_q + 1) // 2))
    nq_pad = _round_up(nq_r, tile_q)

    w_bbox = float(cost_bbox)
    bbox_scale = abs(w_bbox)
    bbox_sign = 1.0 if w_bbox >= 0.0 else -1.0

    logits = pred_logits.astype(jnp.float32)
    boxes = pred_boxes.astype(jnp.float32)
    if nq_pad != nq:
        logits = jnp.pad(logits, ((0, 0), (0, nq_pad - nq), (0, 0)))
        filler = jnp.broadcast_to(jnp.asarray([0.5, 0.5, 1.0, 1.0], jnp.float32),
                                  (bs, nq_pad - nq, 4))
        boxes = jnp.concatenate([boxes, filler], axis=1)

    # fp16 round-trip only for the GIoU coordinates (matches the torch module);
    # L1 coordinates stay f32 and carry the bbox weight.
    boxes_q = boxes.astype(jnp.float16).astype(jnp.float32)
    boxes_stacked = jnp.concatenate([boxes * bbox_scale, boxes_q], axis=-1)  # (bs,nq_pad,8)

    # Per-image targets padded with benign boxes (area 1, no NaN); one-hot class
    # columns precomputed in the wrapper (zero for padded lanes).
    class_ids = jnp.arange(num_classes, dtype=jnp.int32)[:, None]            # (C, 1)
    tb, oh = [], []
    for b, l in zip(tgt_boxes_list, tgt_labels_list):
        s = int(b.shape[0])
        bb = jnp.asarray(b, jnp.float32).reshape(s, 4)
        ids = jnp.asarray(l, jnp.int32).reshape(s)
        pad_rows = t_pad - s
        bfill = jnp.broadcast_to(jnp.asarray([0.5, 0.5, 1.0, 1.0], jnp.float32),
                                 (pad_rows, 4))
        ifill = -jnp.ones((pad_rows,), jnp.int32)
        bb = jnp.concatenate([bb, bfill], axis=0) if s else bfill
        ids = jnp.concatenate([ids, ifill]) if s else ifill
        tb.append(bb)
        oh.append((class_ids == ids[None, :]).astype(jnp.float32))            # (C, t_pad)
    tgt_full = jnp.stack(tb, axis=0)                                          # (bs,t_pad,4)
    tgt_q = tgt_full.astype(jnp.float16).astype(jnp.float32)
    tgt_stacked = jnp.concatenate([jnp.swapaxes(tgt_full * bbox_scale, 1, 2),
                                   jnp.swapaxes(tgt_q, 1, 2)], axis=1)        # (bs,8,t_pad)
    onehot = jnp.stack(oh, axis=0) * (-float(cost_class))                     # (bs,C,t_pad)

    kernel = functools.partial(_cost_kernel, bbox_sign, float(cost_giou))

    c = pl.pallas_call(
        kernel,
        out_shape=jax.ShapeDtypeStruct((bs, nq_pad, t_pad), jnp.float32),
        grid=(bs, nq_pad // tile_q),
        in_specs=[
            pl.BlockSpec((None, tile_q, num_classes), lambda b, q: (b, q, 0)),
            pl.BlockSpec((None, tile_q, 8), lambda b, q: (b, q, 0)),
            # Constant block index across q -> Pallas re-uses the resident block.
            pl.BlockSpec((None, 8, t_pad), lambda b, q: (b, 0, 0)),
            pl.BlockSpec((None, num_classes, t_pad), lambda b, q: (b, 0, 0)),
        ],
        out_specs=pl.BlockSpec((None, tile_q, t_pad), lambda b, q: (b, q, 0)),
        compiler_params=pltpu.CompilerParams(
            dimension_semantics=("parallel", "parallel")),
    )(logits, boxes_stacked, tgt_stacked, onehot)

    return c


# -----------------------------------------------------------------------------
# Host-side Hungarian algorithm
# TODO(synk): linear_sum_assignment is a sequential, data-dependent algorithm
# with no clean Pallas equivalent; it runs on the host (scipy or numpy).
# -----------------------------------------------------------------------------
def _lsa_numpy(cost):
    cost = np.asarray(cost, dtype=np.float64)
    transposed = False
    if cost.shape[0] > cost.shape[1]:
        cost = cost.T
        transposed = True
    n, m = cost.shape
    if n == 0 or m == 0:
        return np.zeros((0,), np.int64), np.zeros((0,), np.int64)
    INF = np.inf
    u = np.zeros(n + 1)
    v = np.zeros(m + 1)
    p = np.zeros(m + 1, dtype=np.int64)
    way = np.zeros(m + 1, dtype=np.int64)
    for i in range(1, n + 1):
        p[0] = i
        j0 = 0
        minv = np.full(m + 1, INF)
        used = np.zeros(m + 1, dtype=bool)
        while True:
            used[j0] = True
            i0 = p[j0]
            free = np.nonzero(~used[1:])[0] + 1
            cur = cost[i0 - 1, free - 1] - u[i0] - v[free]
            better = cur < minv[free]
            minv[free] = np.where(better, cur, minv[free])
            way[free] = np.where(better, j0, way[free])
            k = int(np.argmin(minv[free]))
            j1 = int(free[k])
            delta = float(minv[j1])
            used_idx = np.nonzero(used)[0]
            u[p[used_idx]] += delta
            v[used_idx] -= delta
            minv[free] -= delta
            j0 = j1
            if p[j0] == 0:
                break
        while True:
            j1 = int(way[j0])
            p[j0] = p[j1]
            j0 = j1
            if j0 == 0:
                break
    rows, cols = [], []
    for j in range(1, m + 1):
        if p[j] != 0:
            rows.append(p[j] - 1)
            cols.append(j - 1)
    rows = np.asarray(rows, dtype=np.int64)
    cols = np.asarray(cols, dtype=np.int64)
    if transposed:
        rows, cols = cols, rows
    order = np.argsort(rows)
    return rows[order], cols[order]


def linear_sum_assignment(cost):
    cost = np.asarray(cost, dtype=np.float64)
    if _scipy_lsa is not None:
        r, c = _scipy_lsa(cost)
        return np.asarray(r, dtype=np.int64), np.asarray(c, dtype=np.int64)
    return _lsa_numpy(cost)


# -----------------------------------------------------------------------------
# Module-equivalent wrapper
# -----------------------------------------------------------------------------
class HungarianMatcherPallas:
    def __init__(self, cost_class=1, cost_bbox=1, cost_giou=1,
                 data_file="ava", binary_loss=False, before=False):
        self.cost_class = float(cost_class)
        self.cost_bbox = float(cost_bbox)
        self.cost_giou = float(cost_giou)
        self.data_file = data_file
        self.binary_loss = binary_loss
        self.before = before
        assert cost_class != 0 or cost_bbox != 0 or cost_giou != 0, "all costs cant be 0"

    def __call__(self, outputs, targets):
        pred_logits = outputs["pred_logits"]
        pred_boxes = outputs["pred_boxes"]
        bs, num_queries = pred_logits.shape[:2]

        boxes_list = [jnp.asarray(v["boxes"])[:, 1:] for v in targets]
        labels_list = [jnp.asarray(v["labels"]) for v in targets]
        sizes = [int(b.shape[0]) for b in boxes_list]

        # Block-diagonal costs only (the matcher never reads cross-image blocks).
        C = compute_cost_matrix(pred_logits, pred_boxes, boxes_list, labels_list,
                                self.cost_class, self.cost_bbox, self.cost_giou)

        # D2H: transfer only the valid region, in f16; upcast on host for LSA.
        t_valid = max(sizes) if sizes else 0
        if t_valid > 0:
            C_small = C[:, :num_queries, :t_valid].astype(jnp.float16)
            C_np = np.asarray(jax.block_until_ready(C_small)).astype(np.float64)
        else:
            C_np = np.zeros((bs, num_queries, 0), np.float64)

        indices = []
        for i, s in enumerate(sizes):
            r, c = linear_sum_assignment(C_np[i, :, :s])
            indices.append((r.astype(np.int64), c.astype(np.int64)))
        return indices


# -----------------------------------------------------------------------------
# Pure-JAX reference for the cost matrix (correctness check, global layout)
# -----------------------------------------------------------------------------
def reference_cost_matrix(pred_logits, pred_boxes, tgt_bbox, tgt_ids,
                          w_class, w_bbox, w_giou):
    bs, nq, nc = pred_logits.shape
    out_bbox = pred_boxes.reshape(-1, 4).astype(jnp.float32)
    tgt = tgt_bbox.astype(jnp.float32)
    cb = jnp.sum(jnp.abs(out_bbox[:, None, :] - tgt[None, :, :]), axis=-1)
    prob = jax.nn.softmax(pred_logits.reshape(-1, nc).astype(jnp.float32), axis=-1)
    cc = -prob[:, tgt_ids]

    o = out_bbox.astype(jnp.float16).astype(jnp.float32)
    t = tgt.astype(jnp.float16).astype(jnp.float32)

    def to_xyxy(b):
        cx, cy, w, h = b[:, 0], b[:, 1], b[:, 2], b[:, 3]
        return jnp.stack([cx - 0.5 * w, cy - 0.5 * h, cx + 0.5 * w, cy + 0.5 * h], -1)

    b1, b2 = to_xyxy(o), to_xyxy(t)
    area1 = (b1[:, 2] - b1[:, 0]) * (b1[:, 3] - b1[:, 1])
    area2 = (b2[:, 2] - b2[:, 0]) * (b2[:, 3] - b2[:, 1])
    lt = jnp.maximum(b1[:, None, :2], b2[None, :, :2])
    rb = jnp.minimum(b1[:, None, 2:], b2[None, :, 2:])
    wh = jnp.clip(rb - lt, 0.0)
    inter = wh[..., 0] * wh[..., 1]
    union = area1[:, None] + area2[None, :] - inter
    iou = inter / union
    lt2 = jnp.minimum(b1[:, None, :2], b2[None, :, :2])
    rb2 = jnp.maximum(b1[:, None, 2:], b2[None, :, 2:])
    wh2 = jnp.clip(rb2 - lt2, 0.0)
    enc = wh2[..., 0] * wh2[..., 1]
    giou = iou - (enc - union) / enc
    cg = -giou
    C = w_bbox * cb + w_class * cc + w_giou * cg
    return C.reshape(bs, nq, -1)


# -----------------------------------------------------------------------------
if __name__ == "__main__":
    key = jax.random.PRNGKey(0)
    bs, num_queries, num_classes = 2, 8, 32
    k1, k2, k3, k4 = jax.random.split(key, 4)

    pred_logits = jax.random.normal(k1, (bs, num_queries, num_classes), jnp.float32)
    centers = jax.random.uniform(k2, (bs, num_queries, 2), minval=0.3, maxval=0.7)
    whs = jax.random.uniform(k3, (bs, num_queries, 2), minval=0.05, maxval=0.3)
    pred_boxes = jnp.concatenate([centers, whs], axis=-1)  # cxcywh in (0,1)

    sizes = [3, 2]
    targets = []
    tk = k4
    for s in sizes:
        tk, ka, kb, kc = jax.random.split(tk, 4)
        c = jax.random.uniform(ka, (s, 2), minval=0.3, maxval=0.7)
        wh = jax.random.uniform(kb, (s, 2), minval=0.05, maxval=0.3)
        frame_col = jnp.zeros((s, 1), jnp.float32)            # dropped by [:, 1:]
        boxes = jnp.concatenate([frame_col, c, wh], axis=-1)  # (s, 5)
        labels = jax.random.randint(kc, (s,), 0, num_classes)
        targets.append({"boxes": boxes, "labels": labels})

    outputs = {"pred_logits": pred_logits, "pred_boxes": pred_boxes}

    # --- kernel vs reference check (compare per-image valid blocks) ---
    boxes_list = [jnp.asarray(t["boxes"])[:, 1:] for t in targets]
    labels_list = [jnp.asarray(t["labels"]) for t in targets]
    C_kernel = np.asarray(jax.block_until_ready(
        compute_cost_matrix(pred_logits, pred_boxes, boxes_list, labels_list,
                            1.0, 1.0, 1.0)))
    tgt_bbox_all = jnp.concatenate([t["boxes"] for t in targets], 0)[:, 1:]
    tgt_ids_all = jnp.concatenate([t["labels"] for t in targets], 0)
    C_ref = np.asarray(reference_cost_matrix(pred_logits, pred_boxes,
                                             tgt_bbox_all, tgt_ids_all,
                                             1.0, 1.0, 1.0))
    off = 0
    for i, s in enumerate(sizes):
        # Tolerance covers the approx (EUP) reciprocals (~1e-4 relative).
        np.testing.assert_allclose(C_kernel[i, :num_queries, :s],
                                   C_ref[i, :, off:off + s],
                                   rtol=2e-3, atol=2e-3)
        off += s

    # --- full matcher forward ---
    matcher = HungarianMatcherPallas(cost_class=1, cost_bbox=1, cost_giou=1)
    indices = matcher(outputs, targets)
    for i, (ri, ci) in enumerate(indices):
        assert len(ri) == len(ci) == min(num_queries, sizes[i])
        assert ri.dtype == np.int64 and ci.dtype == np.int64

    print("KERNEL_OK")
</pallas_src>

<mosaic_0001>
module attributes {stable_mosaic.version = 11 : i64} {
  func.func @_cost_kernel(%arg0: i32, %arg1: i32, %arg2: memref<1x8x32xf32, #tpu.memory_space<vmem>>, %arg3: memref<1x8x8xf32, #tpu.memory_space<vmem>>, %arg4: memref<1x8x128xf32, #tpu.memory_space<vmem>>, %arg5: memref<1x32x128xf32, #tpu.memory_space<vmem>>, %arg6: memref<1x8x128xf32, #tpu.memory_space<vmem>>) attributes {dimension_semantics = [#tpu.dimension_semantics<parallel>, #tpu.dimension_semantics<parallel>], iteration_bounds = array<i64: 2, 1>, scalar_prefetch = 0 : i64, scratch_operands = 0 : i64, tpu.core_type = #tpu.core_type<tc>, window_params = [{transform_indices = @transform_0, window_bounds = array<i64: 1, 8, 32>}, {transform_indices = @transform_1, window_bounds = array<i64: 1, 8, 8>}, {transform_indices = @transform_2, window_bounds = array<i64: 1, 8, 128>}, {transform_indices = @transform_3, window_bounds = array<i64: 1, 32, 128>}, {transform_indices = @transform_4, window_bounds = array<i64: 1, 8, 128>}]} {
    %c0 = arith.constant 0 : index
    %c0_0 = arith.constant 0 : index
    %c0_1 = arith.constant 0 : index
    %0 = vector.load %arg2[%c0, %c0_0, %c0_1] : memref<1x8x32xf32, #tpu.memory_space<vmem>>, vector<1x8x32xf32>
    %1 = vector.shape_cast %0 : vector<1x8x32xf32> to vector<8x32xf32>
    %c0_2 = arith.constant 0 : index
    %c0_3 = arith.constant 0 : index
    %c0_4 = arith.constant 0 : index
    %2 = vector.load %arg3[%c0_2, %c0_3, %c0_4] : memref<1x8x8xf32, #tpu.memory_space<vmem>>, vector<1x8x8xf32>
    %3 = vector.shape_cast %2 : vector<1x8x8xf32> to vector<8x8xf32>
    %c0_5 = arith.constant 0 : index
    %c0_6 = arith.constant 0 : index
    %c0_7 = arith.constant 0 : index
    %4 = vector.load %arg4[%c0_5, %c0_6, %c0_7] : memref<1x8x128xf32, #tpu.memory_space<vmem>>, vector<1x8x128xf32>
    %5 = vector.shape_cast %4 : vector<1x8x128xf32> to vector<8x128xf32>
    %c0_8 = arith.constant 0 : index
    %c0_9 = arith.constant 0 : index
    %c0_10 = arith.constant 0 : index
    %6 = vector.load %arg5[%c0_8, %c0_9, %c0_10] : memref<1x32x128xf32, #tpu.memory_space<vmem>>, vector<1x32x128xf32>
    %7 = vector.shape_cast %6 : vector<1x32x128xf32> to vector<32x128xf32>
    %8 = vector.extract_strided_slice %3 {offsets = [0, 0], sizes = [8, 1], strides = [1, 1]} : vector<8x8xf32> to vector<8x1xf32>
    %9 = vector.extract_strided_slice %5 {offsets = [0, 0], sizes = [1, 128], strides = [1, 1]} : vector<8x128xf32> to vector<1x128xf32>
    %10 = vector.broadcast %8 : vector<8x1xf32> to vector<8x128xf32>
    %11 = vector.broadcast %9 : vector<1x128xf32> to vector<8x128xf32>
    %12 = arith.subf %10, %11 : vector<8x128xf32>
    %13 = math.absf %12 : vector<8x128xf32>
    %14 = vector.extract_strided_slice %3 {offsets = [0, 1], sizes = [8, 1], strides = [1, 1]} : vector<8x8xf32> to vector<8x1xf32>
    %15 = vector.extract_strided_slice %5 {offsets = [1, 0], sizes = [1, 128], strides = [1, 1]} : vector<8x128xf32> to vector<1x128xf32>
    %16 = vector.broadcast %14 : vector<8x1xf32> to vector<8x128xf32>
    %17 = vector.broadcast %15 : vector<1x128xf32> to vector<8x128xf32>
    %18 = arith.subf %16, %17 : vector<8x128xf32>
    %19 = math.absf %18 : vector<8x128xf32>
    %20 = arith.addf %13, %19 : vector<8x128xf32>
    %21 = vector.extract_strided_slice %3 {offsets = [0, 2], sizes = [8, 1], strides = [1, 1]} : vector<8x8xf32> to vector<8x1xf32>
    %22 = vector.extract_strided_slice %5 {offsets = [2, 0], sizes = [1, 128], strides = [1, 1]} : vector<8x128xf32> to vector<1x128xf32>
    %23 = vector.broadcast %21 : vector<8x1xf32> to vector<8x128xf32>
    %24 = vector.broadcast %22 : vector<1x128xf32> to vector<8x128xf32>
    %25 = arith.subf %23, %24 : vector<8x128xf32>
    %26 = math.absf %25 : vector<8x128xf32>
    %27 = arith.addf %20, %26 : vector<8x128xf32>
    %28 = vector.extract_strided_slice %3 {offsets = [0, 3], sizes = [8, 1], strides = [1, 1]} : vector<8x8xf32> to vector<8x1xf32>
    %29 = vector.extract_strided_slice %5 {offsets = [3, 0], sizes = [1, 128], strides = [1, 1]} : vector<8x128xf32> to vector<1x128xf32>
    %30 = vector.broadcast %28 : vector<8x1xf32> to vector<8x128xf32>
    %31 = vector.broadcast %29 : vector<1x128xf32> to vector<8x128xf32>
    %32 = arith.subf %30, %31 : vector<8x128xf32>
    %33 = math.absf %32 : vector<8x128xf32>
    %34 = arith.addf %27, %33 : vector<8x128xf32>
    %cst = arith.constant dense<0xFF800000> : vector<8xf32>
    %35 = vector.multi_reduction <maximumf>, %1, %cst [1] : vector<8x32xf32> to vector<8xf32>
    %36 = vector.shape_cast %35 : vector<8xf32> to vector<8x1xf32>
    %37 = vector.broadcast %36 : vector<8x1xf32> to vector<8x32xf32>
    %38 = arith.subf %1, %37 : vector<8x32xf32>
    %39 = math.exp %38 : vector<8x32xf32>
    %cst_11 = arith.constant dense<0.000000e+00> : vector<8xf32>
    %40 = vector.multi_reduction <add>, %39, %cst_11 [1] : vector<8x32xf32> to vector<8xf32>
    %41 = vector.shape_cast %40 : vector<8xf32> to vector<8x1xf32>
    %42 = tpu.reciprocal %41 {approx = true} : vector<8x1xf32> -> vector<8x1xf32>
    %43 = vector.broadcast %42 : vector<8x1xf32> to vector<8x32xf32>
    %44 = arith.mulf %39, %43 : vector<8x32xf32>
    %cst_12 = arith.constant dense<0.000000e+00> : vector<8x128xf32>
    %45 = tpu.matmul %44, %7, %cst_12 {dimension_numbers = #tpu.dot_dimension_numbers<[1], [0], [0], [1], [0, 0, 1, 1], [], []>} : vector<8x32xf32>, vector<32x128xf32>, vector<8x128xf32> -> vector<8x128xf32>
    %46 = vector.extract_strided_slice %3 {offsets = [0, 4], sizes = [8, 1], strides = [1, 1]} : vector<8x8xf32> to vector<8x1xf32>
    %47 = vector.extract_strided_slice %3 {offsets = [0, 6], sizes = [8, 1], strides = [1, 1]} : vector<8x8xf32> to vector<8x1xf32>
    %cst_13 = arith.constant 5.000000e-01 : f32
    %48 = vector.broadcast %cst_13 : f32 to vector<8x1xf32>
    %49 = arith.mulf %48, %47 : vector<8x1xf32>
    %50 = arith.subf %46, %49 : vector<8x1xf32>
    %51 = vector.extract_strided_slice %3 {offsets = [0, 5], sizes = [8, 1], strides = [1, 1]} : vector<8x8xf32> to vector<8x1xf32>
    %52 = vector.extract_strided_slice %3 {offsets = [0, 7], sizes = [8, 1], strides = [1, 1]} : vector<8x8xf32> to vector<8x1xf32>
    %cst_14 = arith.constant 5.000000e-01 : f32
    %53 = vector.broadcast %cst_14 : f32 to vector<8x1xf32>
    %54 = arith.mulf %53, %52 : vector<8x1xf32>
    %55 = arith.subf %51, %54 : vector<8x1xf32>
    %56 = vector.extract_strided_slice %3 {offsets = [0, 4], sizes = [8, 1], strides = [1, 1]} : vector<8x8xf32> to vector<8x1xf32>
    %57 = vector.extract_strided_slice %3 {offsets = [0, 6], sizes = [8, 1], strides = [1, 1]} : vector<8x8xf32> to vector<8x1xf32>
    %cst_15 = arith.constant 5.000000e-01 : f32
    %58 = vector.broadcast %cst_15 : f32 to vector<8x1xf32>
    %59 = arith.mulf %58, %57 : vector<8x1xf32>
    %60 = arith.addf %56, %59 : vector<8x1xf32>
    %61 = vector.extract_strided_slice %3 {offsets = [0, 5], sizes = [8, 1], strides = [1, 1]} : vector<8x8xf32> to vector<8x1xf32>
    %62 = vector.extract_strided_slice %3 {offsets = [0, 7], sizes = [8, 1], strides = [1, 1]} : vector<8x8xf32> to vector<8x1xf32>
    %cst_16 = arith.constant 5.000000e-01 : f32
    %63 = vector.broadcast %cst_16 : f32 to vector<8x1xf32>
    %64 = arith.mulf %63, %62 : vector<8x1xf32>
    %65 = arith.addf %61, %64 : vector<8x1xf32>
    %66 = vector.extract_strided_slice %5 {offsets = [4, 0], sizes = [1, 128], strides = [1, 1]} : vector<8x128xf32> to vector<1x128xf32>
    %67 = vector.extract_strided_slice %5 {offsets = [6, 0], sizes = [1, 128], strides = [1, 1]} : vector<8x128xf32> to vector<1x128xf32>
    %cst_17 = arith.constant 5.000000e-01 : f32
    %68 = vector.broadcast %cst_17 : f32 to vector<1x128xf32>
    %69 = arith.mulf %68, %67 : vector<1x128xf32>
    %70 = arith.subf %66, %69 : vector<1x128xf32>
    %71 = vector.extract_strided_slice %5 {offsets = [5, 0], sizes = [1, 128], strides = [1, 1]} : vector<8x128xf32> to vector<1x128xf32>
    %72 = vector.extract_strided_slice %5 {offsets = [7, 0], sizes = [1, 128], strides = [1, 1]} : vector<8x128xf32> to vector<1x128xf32>
    %cst_18 = arith.constant 5.000000e-01 : f32
    %73 = vector.broadcast %cst_18 : f32 to vector<1x128xf32>
    %74 = arith.mulf %73, %72 : vector<1x128xf32>
    %75 = arith.subf %71, %74 : vector<1x128xf32>
    %76 = vector.extract_strided_slice %5 {offsets = [4, 0], sizes = [1, 128], strides = [1, 1]} : vector<8x128xf32> to vector<1x128xf32>
    %77 = vector.extract_strided_slice %5 {offsets = [6, 0], sizes = [1, 128], strides = [1, 1]} : vector<8x128xf32> to vector<1x128xf32>
    %cst_19 = arith.constant 5.000000e-01 : f32
    %78 = vector.broadcast %cst_19 : f32 to vector<1x128xf32>
    %79 = arith.mulf %78, %77 : vector<1x128xf32>
    %80 = arith.addf %76, %79 : vector<1x128xf32>
    %81 = vector.extract_strided_slice %5 {offsets = [5, 0], sizes = [1, 128], strides = [1, 1]} : vector<8x128xf32> to vector<1x128xf32>
    %82 = vector.extract_strided_slice %5 {offsets = [7, 0], sizes = [1, 128], strides = [1, 1]} : vector<8x128xf32> to vector<1x128xf32>
    %cst_20 = arith.constant 5.000000e-01 : f32
    %83 = vector.broadcast %cst_20 : f32 to vector<1x128xf32>
    %84 = arith.mulf %83, %82 : vector<1x128xf32>
    %85 = arith.addf %81, %84 : vector<1x128xf32>
    %86 = arith.subf %60, %50 : vector<8x1xf32>
    %87 = arith.subf %65, %55 : vector<8x1xf32>
    %88 = arith.mulf %86, %87 : vector<8x1xf32>
    %89 = arith.subf %80, %70 : vector<1x128xf32>
    %90 = arith.subf %85, %75 : vector<1x128xf32>
    %91 = arith.mulf %89, %90 : vector<1x128xf32>
    %92 = vector.broadcast %60 : vector<8x1xf32> to vector<8x128xf32>
    %93 = vector.broadcast %80 : vector<1x128xf32> to vector<8x128xf32>
    %94 = arith.minimumf %92, %93 : vector<8x128xf32>
    %95 = vector.broadcast %50 : vector<8x1xf32> to vector<8x128xf32>
    %96 = vector.broadcast %70 : vector<1x128xf32> to vector<8x128xf32>
    %97 = arith.maximumf %95, %96 : vector<8x128xf32>
    %98 = arith.subf %94, %97 : vector<8x128xf32>
    %cst_21 = arith.constant 0.000000e+00 : f32
    %99 = vector.broadcast %cst_21 : f32 to vector<8x128xf32>
    %100 = arith.maximumf %98, %99 : vector<8x128xf32>
    %101 = vector.broadcast %65 : vector<8x1xf32> to vector<8x128xf32>
    %102 = vector.broadcast %85 : vector<1x128xf32> to vector<8x128xf32>
    %103 = arith.minimumf %101, %102 : vector<8x128xf32>
    %104 = vector.broadcast %55 : vector<8x1xf32> to vector<8x128xf32>
    %105 = vector.broadcast %75 : vector<1x128xf32> to vector<8x128xf32>
    %106 = arith.maximumf %104, %105 : vector<8x128xf32>
    %107 = arith.subf %103, %106 : vector<8x128xf32>
    %cst_22 = arith.constant 0.000000e+00 : f32
    %108 = vector.broadcast %cst_22 : f32 to vector<8x128xf32>
    %109 = arith.maximumf %107, %108 : vector<8x128xf32>
    %110 = arith.mulf %100, %109 : vector<8x128xf32>
    %111 = vector.broadcast %88 : vector<8x1xf32> to vector<8x128xf32>
    %112 = vector.broadcast %91 : vector<1x128xf32> to vector<8x128xf32>
    %113 = arith.addf %111, %112 : vector<8x128xf32>
    %114 = arith.subf %113, %110 : vector<8x128xf32>
    %115 = tpu.reciprocal %114 {approx = true} : vector<8x128xf32> -> vector<8x128xf32>
    %116 = arith.mulf %110, %115 : vector<8x128xf32>
    %117 = vector.broadcast %60 : vector<8x1xf32> to vector<8x128xf32>
    %118 = vector.broadcast %80 : vector<1x128xf32> to vector<8x128xf32>
    %119 = arith.maximumf %117, %118 : vector<8x128xf32>
    %120 = vector.broadcast %50 : vector<8x1xf32> to vector<8x128xf32>
    %121 = vector.broadcast %70 : vector<1x128xf32> to vector<8x128xf32>
    %122 = arith.minimumf %120, %121 : vector<8x128xf32>
    %123 = arith.subf %119, %122 : vector<8x128xf32>
    %124 = vector.broadcast %65 : vector<8x1xf32> to vector<8x128xf32>
    %125 = vector.broadcast %85 : vector<1x128xf32> to vector<8x128xf32>
    %126 = arith.maximumf %124, %125 : vector<8x128xf32>
    %127 = vector.broadcast %55 : vector<8x1xf32> to vector<8x128xf32>
    %128 = vector.broadcast %75 : vector<1x128xf32> to vector<8x128xf32>
    %129 = arith.minimumf %127, %128 : vector<8x128xf32>
    %130 = arith.subf %126, %129 : vector<8x128xf32>
    %131 = arith.mulf %123, %130 : vector<8x128xf32>
    %132 = arith.subf %131, %114 : vector<8x128xf32>
    %133 = tpu.reciprocal %131 {approx = true} : vector<8x128xf32> -> vector<8x128xf32>
    %134 = arith.mulf %132, %133 : vector<8x128xf32>
    %135 = arith.subf %116, %134 : vector<8x128xf32>
    %136 = arith.addf %34, %45 : vector<8x128xf32>
    %cst_23 = arith.constant 1.000000e+00 : f32
    %137 = vector.broadcast %cst_23 : f32 to vector<8x128xf32>
    %138 = arith.mulf %137, %135 : vector<8x128xf32>
    %139 = arith.subf %136, %138 : vector<8x128xf32>
    %c0_24 = arith.constant 0 : index
    %c0_25 = arith.constant 0 : index
    %c0_26 = arith.constant 0 : index
    %140 = vector.load %arg6[%c0_24, %c0_25, %c0_26] : memref<1x8x128xf32, #tpu.memory_space<vmem>>, vector<1x8x128xf32>
    %141 = vector.shape_cast %140 : vector<1x8x128xf32> to vector<8x128xf32>
    %142 = vector.shape_cast %139 : vector<8x128xf32> to vector<1x8x128xf32>
    tpu.vector_store %arg6[%c0_24, %c0_25, %c0_26], %142 {strides = array<i32>} : memref<1x8x128xf32, #tpu.memory_space<vmem>>, vector<1x8x128xf32>,
    return
  }
  func.func @transform_0(%arg0: i32, %arg1: i32) -> (i32, i32, i32) {
    %c0_i32 = arith.constant 0 : i32
    %c0_i32_0 = arith.constant 0 : i32
    return %arg0, %arg1, %c0_i32 : i32, i32, i32
  }
  func.func @transform_1(%arg0: i32, %arg1: i32) -> (i32, i32, i32) {
    %c0_i32 = arith.constant 0 : i32
    %c0_i32_0 = arith.constant 0 : i32
    return %arg0, %arg1, %c0_i32 : i32, i32, i32
  }
  func.func @transform_2(%arg0: i32, %arg1: i32) -> (i32, i32, i32) {
    %c0_i32 = arith.constant 0 : i32
    %c0_i32_0 = arith.constant 0 : i32
    %c0_i32_1 = arith.constant 0 : i32
    return %arg0, %c0_i32, %c0_i32_0 : i32, i32, i32
  }
  func.func @transform_3(%arg0: i32, %arg1: i32) -> (i32, i32, i32) {
    %c0_i32 = arith.constant 0 : i32
    %c0_i32_0 = arith.constant 0 : i32
    %c0_i32_1 = arith.constant 0 : i32
    return %arg0, %c0_i32, %c0_i32_0 : i32, i32, i32
  }
  func.func @transform_4(%arg0: i32, %arg1: i32) -> (i32, i32, i32) {
    %c0_i32 = arith.constant 0 : i32
    %c0_i32_0 = arith.constant 0 : i32
    return %arg0, %arg1, %c0_i32 : i32, i32, i32
  }
}

</mosaic_0001>

<bundles_post_ra>
// kernel: tpu_custom_call.1
= control target key start
LH: loop header
LB: loop body
LE: loop exit
PB: predicated region body
PF: predicated region fallthrough
CT: control target
= control target key end

     0   :  { %s1352_s0 = inlined_call_operand.hbm [shape: f32[2,8,32], index: 0, kind: input, shape index: {}]   ;;  %s1353_s1 = inlined_call_operand.hbm [shape: f32[2,8,8], index: 1, kind: input, shape index: {}]   ;;  %s1354_s2 = inlined_call_operand.hbm [shape: f32[2,8,128], index: 2, kind: input, shape index: {}]   ;;  %s1355_s3 = inlined_call_operand.hbm [shape: f32[2,32,128], index: 3, kind: input, shape index: {}]   ;;  %s1356_s4 = inlined_call_operand.hbm [shape: f32[2,8,128], index: 4, kind: output, shape index: {}]  }
   0x1   :  { %1361 = sst [smem:[#allocation19_spill]] %s1353_s1 }
   0x2   :  { %9 = vsyncpa [#allocation3], 0 }
   0x3   :  { %11 = vsyncpa [#allocation3 + $0x1], 0 }
   0x4   :  { %12 = vsyncpa [#allocation6], 0 }
   0x5   :  { %14 = vsyncpa [#allocation6 + $0x1], 0 }
   0x6   :  { %15 = vsyncpa [#allocation9], 0 }
   0x7   :  { %17 = vsyncpa [#allocation9 + $0x1], 0 }
   0x8   :  { %18 = vsyncpa [#allocation4], 0 }
   0x9   :  { %20 = vsyncpa [#allocation4 + $0x1], 0  ;;  %s1126_s15 = smov 0   ;;  %s1128_s16 = smov 0  }
   0xa   :  { %s1130_s17 = smov 0   ;;  %s1132_s18 = smov 0  }
   0xb   :  { %s1134_s19 = smov 0   ;;  %s1136_s20 = smov 0  }
   0xc LB: > { %1362 = sst [smem:[#allocation15_spill]] %s1070_s17  ;;  %s1157_s21 = sadd.s32 4294967295, %s1082_s20   ;;  %s1082_s20 = sphi %s1136_s20, %s26_s20   ;;  %s1078_s19 = sphi %s1134_s19, %s1381_s19   ;;  %s1074_s18 = sphi %s1132_s18, %s1380_s18   ;;  %s1070_s17 = sphi %s1130_s17, %s1376_s17   ;;  %s1066_s16 = sphi %s1128_s16, %s1379_s16   ;;  %s1062_s15 = sphi %s1126_s15, %s1378_s15  }
   0xd   : > { %1363 = sst [smem:[#allocation16_spill]] %s1082_s20  ;;  %s737_s22 = sadd.s32 4294967294, %s1082_s20  }
   0xe   : > { %s38_s23 = sadd.s32 1, %s1078_s19  ;;  %s47_s24 = sadd.s32 1, %s1070_s17 }
   0xf   : > { %p40_p0 = scmp.ge.s32.totalorder %s38_s23, 2  ;;  %p54_p1 = scmp.ne.s32.totalorder %s1070_s17, %s1066_s16 }
  0x10   : > { %p55_p2 = scmp.eq.s32.totalorder %s1082_s20, 0  ;;  %p60_p3 = scmp.ne.s32.totalorder %s1066_s16, %s1062_s15 }
  0x11   : > { %s1383_s23 = smov (%p40_p0, %s38_s23), 0  ;;  %p61_p5 = scmp.eq.s32.totalorder %s1157_s21, 0 }
  0x12   : > { %1364 = sst [smem:[#allocation17_spill]] %s1383_s23  ;;  %p1169_p4 = por %p55_p2, %p54_p1 }
  0x13   : > { %s42_s26 = ssub.s32 %s1078_s19, %s1383_s23  ;;  %p166_p6 = scmp.eq.s32.totalorder %s1157_s21, 1 }
  0x14   : > { %p45_p7 = scmp.eq.s32.totalorder %s42_s26, 0  ;;  %p1177_p8 = por %p61_p5, %p60_p3 }
  0x15   : > { %p1181_p9 = por %p166_p6, %p54_p1  ;;  %p172_p10 = scmp.eq.s32.totalorder %s737_s22, 1 }
  0x16   : > { %s1186_s29 = scalar_select %p45_p7, %s1070_s17, %s47_s24  }
  0x17   : > { %p1188_p11 = por %p172_p10, %p60_p3  ;;  %p804_p13 = scmp.lt.s32.totalorder %s1082_s20, 2 }
  0x18   : > { %1368 = sst [smem:[#allocation18_spill]] %s1186_s29  ;;  %s1195_s5 = sand.u32 1, %s1070_s17  }
  0x19   : > { %s1198_s6 = sshll.u32 %s1195_s5, 3  ;;  %s1201_s7 = sshll.u32 %s1078_s19, 7 }
  0x1a   : > { %p1205_p0 = pnand %p804_p13, %p1169_p4  ;;  %s211_s9 = sand.u32 1, %s1082_s20  }
  0x1b   : > { %s1371_s1 = sld [smem:[#allocation19_spill]]  ;;  %s215_s13 = scalar_lea.vmem [#allocation5], %s1198_s6 }
  0x1c   : > { %s223_s14 = sshll.u32 %s215_s13, 4  ;;  %p749_p1 = scmp.ge.s32.totalorder %s1082_s20, 1  ;;  %s224_s14 = int_to_ptr.vmem [resolvable:$true] %s223_s14 }
  0x1d   : > { %p267_p2 = scmp.lt.s32.totalorder %s1082_s20, 3  ;;  %s1217_s22 = scalar_lea.sflag [#allocation6], %s211_s9 }
  0x1e   : > { %p884_p3 = pneg %p1205_p0  ;;  %s895_s24 = scalar_lea.vmem %s224_s14, 128 }
  0x1f   : > { %p896_p4 = scmp.ne.s32.totalorder %s224_s14, %s895_s24  ;;  %s1084_s25 = smov [#allocation5]  }
  0x20   : > { %s900_s26 = sshll.u32 %s1084_s25, 4  ;;  %s901_s26 = int_to_ptr.vmem [resolvable:$false] %s900_s26 }
  0x21   : > { %s221_s12 = scalar_lea.hbm %s1371_s1, %s1201_s7  ;;  %p898_p5 = pnand %p896_p4, %p884_p3 }
  0x22   : > { %s902_s10 = scalar_lea.vmem %s901_s26, 256  ;;  %p903_p7 = scmp.lt.s32.totalorder %s224_s14, %s901_s26 }
  0x23   : > { %p899_p6 = pneg %p898_p5  ;;  %p904_p10 = scmp.lt.s32.totalorder %s902_s10, %s895_s24 }
  0x25   : > { %p905_p13 = por %p904_p10, %p903_p7 }
  0x27   : > { %p906_p12 = pnand %p905_p13, %p899_p6 }
  0x29   : > { %909 = shalt.err (!%p906_p12)
}
  0x2a   : > { %793 = dma.hbm_to_vmem [thread:$0]  (!%p1205_p0), %s221_s12, 128, %s224_s14, %s1217_s22  }
  0x2b   : > { %p1231_p4 = pnand %p749_p1, %p267_p2  ;;  %s202_s24 = scalar_lea.hbm %s1352_s0, %s1201_s7 }
  0x2c   : > { %s196_s25 = scalar_lea.vmem [#allocation2], %s1198_s6  ;;  %s239_s23 = scalar_lea.hbm %s1354_s2, %s1201_s7 }
  0x2d   : > { %s204_s26 = sshll.u32 %s196_s25, 4  ;;  %s193_s29 = scalar_lea.sflag [#allocation3], %s1195_s5  ;;  %s205_s26 = int_to_ptr.vmem [resolvable:$true] %s204_s26 }
  0x2e   : > { %s923_s17 = scalar_lea.vmem %s205_s26, 128  ;;  %s1085_s12 = smov [#allocation2]  }
  0x2f   : > { %p924_p12 = scmp.ne.s32.totalorder %s205_s26, %s923_s17  ;;  %s928_s14 = sshll.u32 %s1085_s12, 4  ;;  %s929_s14 = int_to_ptr.vmem [resolvable:$false] %s928_s14 }
  0x30   : > { %s930_s20 = scalar_lea.vmem %s929_s14, 256  ;;  %p931_p5 = scmp.lt.s32.totalorder %s205_s26, %s929_s14 }
  0x31   : > { %p926_p1 = pnand %p924_p12, %p884_p3  ;;  %p932_p6 = scmp.lt.s32.totalorder %s930_s20, %s923_s17 }
  0x33   : > { %p927_p2 = pneg %p926_p1  ;;  %p933_p7 = por %p932_p6, %p931_p5 }
  0x35   : > { %p934_p10 = pnand %p933_p7, %p927_p2 }
  0x37   : > { %937 = shalt.err (!%p934_p10)
}
  0x38   : > { %790 = dma.hbm_to_vmem [thread:$0]  (!%p1205_p0), %s202_s24, 128, %s205_s26, %s193_s29  }
  0x39   : > { %s234_s1 = scalar_lea.vmem [#allocation7], %s1198_s6  ;;  %s746_s13 = sshll.u32 %s1195_s5, 5 }
  0x3a   : > { %s241_s11 = sshll.u32 %s234_s1, 4  ;;  %s1086_s17 = smov [#allocation7]   ;;  %s242_s11 = int_to_ptr.vmem [resolvable:$true] %s241_s11 }
  0x3b   : > { %s951_s25 = scalar_lea.vmem %s242_s11, 128  ;;  %s956_s20 = sshll.u32 %s1086_s17, 4  ;;  %s957_s20 = int_to_ptr.vmem [resolvable:$false] %s956_s20 }
  0x3c   : > { %p952_p13 = scmp.ne.s32.totalorder %s242_s11, %s951_s25  ;;  %s958_s10 = scalar_lea.vmem %s957_s20, 256 }
  0x3d   : > { %p959_p2 = scmp.lt.s32.totalorder %s242_s11, %s957_s20  ;;  %p960_p5 = scmp.lt.s32.totalorder %s958_s10, %s951_s25 }
  0x3e   : > { %p954_p12 = pnand %p952_p13, %p884_p3 }
  0x3f   : > { %p961_p6 = por %p960_p5, %p959_p2 }
  0x40   : > { %p955_p1 = pneg %p954_p12 }
  0x42   : > { %p962_p7 = pnand %p961_p6, %p955_p1 }
  0x44   : > { %965 = shalt.err (!%p962_p7)
}
  0x45   : > { %796 = dma.hbm_to_vmem [thread:$0]  (!%p1205_p0), %s239_s23, 128, %s242_s11, %s1217_s22  }
  0x46   : > { %s760_s24 = sshll.u32 %s1078_s19, 9  ;;  %s252_s1 = scalar_lea.vmem [#allocation8], %s746_s13 }
  0x47   : > { %s258_s14 = scalar_lea.hbm %s1355_s3, %s760_s24  ;;  %s259_s25 = sshll.u32 %s252_s1, 4  ;;  %s260_s25 = int_to_ptr.vmem [resolvable:$true] %s259_s25 }
  0x48   : > { %s249_s17 = scalar_lea.sflag [#allocation9], %s1195_s5  ;;  %s979_s20 = scalar_lea.vmem %s260_s25, 512 }
  0x49   : > { %p980_p10 = scmp.ne.s32.totalorder %s260_s25, %s979_s20  ;;  %s1087_s7 = smov [#allocation8]  }
  0x4a   : > { %s984_s10 = sshll.u32 %s1087_s7, 4  ;;  %s985_s10 = int_to_ptr.vmem [resolvable:$false] %s984_s10 }
  0x4b   : > { %p982_p13 = pnand %p980_p10, %p884_p3  ;;  %s986_s29 = scalar_lea.vmem %s985_s10, 1024 }
  0x4c   : > { %p987_p1 = scmp.lt.s32.totalorder %s260_s25, %s985_s10  ;;  %p988_p2 = scmp.lt.s32.totalorder %s986_s29, %s979_s20 }
  0x4d   : > { %p983_p12 = pneg %p982_p13 }
  0x4e   : > { %p989_p5 = por %p988_p2, %p987_p1 }
  0x50   : > { %p990_p6 = pnand %p989_p5, %p983_p12 }
  0x52   : > { %993 = shalt.err (!%p990_p6)
}
  0x53   : > { %s1088_s23 = smov 128   ;;  %s1089_s22 = smov 8  }
  0x54   : > { %799 = dma.hbm_to_vmem [thread:$0]  (!%p1205_p0), %s258_s14, 512, %s260_s25, %s249_s17, %s1088_s23, %s1088_s23, %s1089_s22  }
  0x55   : > { %271 = sbr.rel (%p1231_p4) target bundleno = 620 (0x26c), region = 36  ;;  %s1276_s5 = sand.u32 (!%p1231_p4), 1, %s1066_s16  }
  0x56   : > { %s1279_s11 = sshll.u32 (!%p1231_p4), %s1276_s5, 3  ;;  %s274_s13 = scalar_lea.sflag (!%p1231_p4), [#allocation3], %s1276_s5 }
  0x57   : > { %s277_s6 = scalar_lea.vmem (!%p1231_p4), [#allocation2], %s1279_s11 }
  0x5a   : > { %1045 = dma.done.wait (%p1177_p8), %s274_s13, 128  }
  0x5b   : > { %1047 = vsyncadd (%p1177_p8), %s274_s13, 4294967168  ;;  %s282_s8 = sand.u32 1, %s1157_s21   ;;  %s286_s24 = scalar_lea.vmem [#allocation5], %s1279_s11 }
  0x5c   : > { %s283_s9 = scalar_lea.sflag [#allocation6], %s282_s8 }
  0x5d   : > { %1049 = dma.done.wait (%p1177_p8), %s283_s9, 256  }
  0x5e   : > { %1051 = vsyncadd (%p1177_p8), %s283_s9, 4294967040  ;;  %s753_s26 = sshll.u32 %s1276_s5, 5  ;;  %s295_s12 = scalar_lea.vmem [#allocation7], %s1279_s11 }
  0x5f   : > { %s301_s14 = scalar_lea.sflag [#allocation9], %s1276_s5  ;;  %s1296_s1 = scalar_lea.vmem [#allocation8], %s753_s26 }
  0x60   : > { %1053 = dma.done.wait (%p1177_p8), %s301_s14, 512  }
  0x61   : > { %1055 = vsyncadd (%p1177_p8), %s301_s14, 4294966784  ;;  %vm395_vm0 = vcmask 261120   ;;  %v344_v0 = vld [vmem:[%s277_s6] sm:$0xff]  ;;  %v345_v1 = vld [vmem:[%s286_s24] sm:$0xff]  ;;  %s1090_s21 = smov 126   ;;  %v1091_v4 = vmov 4   ;;  %v356_v31 = vlaneseq }
  0x62   : > { %v396_v2 = vsel %vm395_vm0, %v344_v0, -inf  ;;  %v480_v3 = vmul.f32 0.5, %v345_v1  ;;  %867 = vset.pattern.permute.xlu1 %v1091_v4  ;;  %866 = vset.pattern.permute.xlu0 %v1091_v4  ;;  %s1092_s25 = smov 127   ;;  %v1093_v9 = vmov 5   ;;  %v350_v15 = vld [vmem:[%s1296_s1 + $0x18] sm:$0xff]  ;;  %v1094_v16 = vmov 0.0  }
  0x63   : > { %397 = vmax.xlane.f32.xlu0 %v396_v2  ;;  %766 = vmatprep.subr.mxu0 %v1094_v16  ;;  %v349_v17 = vld [vmem:[%s1296_s1 + $0x10] sm:$0xff]  ;;  %vm1095_vm1 = vmmov 0   ;;  %v348_v18 = vld [vmem:[%s1296_s1 + $0x8] sm:$0xff]  ;;  %v347_v19 = vld [vmem:[%s1296_s1] sm:$0xff]  ;;  %v1096_v22 = vmov 0   ;;  %v1097_v23 = vmov 1  }
  0x64   : > { %482 = vrot.lane.b32.xlu1 %v480_v3, %s1090_s21  ;;  %774 = vmatprep.mubr.msk.f32.mxu0 %vm1095_vm1, %v1094_v16  ;;  %v1098_v24 = vmov 2   ;;  %v1099_v25 = vmov 3   ;;  %v346_v29 = vld [vmem:[%s295_s12] sm:$0xff]  ;;  %v357_v34 = vshrl.u32 %v356_v31, 7  ;;  %s757_s27 = sshll.u32 %s1074_s18, 7  ;;  %s343_s17 = scalar_lea.vmem [#allocation10], %s1279_s11 }
  0x65   : > { %767 = vmatpush3.msra.mxu0 %v350_v15  ;;  %v487_v30 = vmul.f32 0.5, %v346_v29  ;;  %s589_s20 = sshll.u32 %s343_s17, 4  ;;  %s587_s29 = scalar_lea.hbm %s1356_s4, %s757_s27  ;;  %s590_s20 = int_to_ptr.vmem [resolvable:$true] %s589_s20 }
  0x66   : > { %768 = vmatprep.subr.mxu0 %v1094_v16  ;;  %v511_v38 = vsub.s32 4, %v357_v34  ;;  %v532_v39 = vsub.s32 5, %v357_v34  ;;  %s575_s23 = scalar_lea.sflag [#allocation4], %s1276_s5  ;;  %s994_s22 = scalar_lea.vmem %s590_s20, 128 }
  0x67   : > { %769 = vmatpush3.msra.mxu0 %v349_v17  ;;  %v489_v33 = vrot.slane %v487_v30, 2  ;;  %p995_p8 = scmp.ne.s32.totalorder %s590_s20, %s994_s22  ;;  %s1100_s13 = smov [#allocation10]  }
  0x68   : > { %770 = vmatprep.subr.mxu0 %v1094_v16  ;;  %s998_s18 = sshll.u32 %s1100_s13, 4  ;;  %s999_s18 = int_to_ptr.vmem [resolvable:$false] %s998_s18 }
  0x69   : > { %771 = vmatpush3.msra.mxu0 %v348_v18  ;;  %v491_v35 = vsub.f32 %v346_v29, %v489_v33  ;;  %v492_v36 = vadd.f32 %v489_v33, %v346_v29  ;;  %p996_p0 = pnand %p995_p8, %p1181_p9  ;;  %s1000_s11 = scalar_lea.vmem %s999_s18, 256 }
  0x6a   : > { %772 = vmatprep.subr.mxu0 %v1094_v16  ;;  %v390_v16 = vsub.s32 3, %v357_v34  ;;  %p1001_p4 = scmp.lt.s32.totalorder %s590_s20, %s999_s18  ;;  %p1002_p7 = scmp.lt.s32.totalorder %s1000_s11, %s994_s22 }
  0x6b   : > { %773 = vmatpush3.msra.mxu0 %v347_v19  ;;  %v499_v40 = vsub.f32 %v492_v36, %v491_v35  ;;  %v522_v41 = vrot.slane %v491_v35, %v511_v38  ;;  %v533_v42 = vrot.slane %v492_v36, %v532_v39  ;;  %v542_v43 = vrot.slane %v491_v35, %v532_v39  ;;  %p997_p3 = pneg %p996_p0 }
  0x6c   : > { %v512_v44 = vrot.slane %v492_v36, %v511_v38  ;;  %p1003_p10 = por %p1002_p7, %p1001_p4 }
  0x6d   : > { %v501_v47 = vrot.slane %v499_v40, 1 }
  0x6e   : > { %p1004_p13 = pnand %p1003_p10, %p997_p3 }
  0x6f   : > { %v503_v54 = vmul.f32 %v501_v47, %v499_v40 }
  0x71   : > { %v555_v58 = vrot.slane %v503_v54, %v511_v38 }
  0xd6   : > { %v483_v5 = vpop.permute.xlu1 %482 }
  0xd7   : > { %v485_v6 = vsub.f32 %v345_v1, %v483_v5  ;;  %v486_v7 = vadd.f32 %v483_v5, %v345_v1  ;;  %v368_v5 = vsub.s32 1, %v357_v34 }
  0xd9   : > { %v493_v8 = vsub.f32 %v486_v7, %v485_v6 }
  0xdb   : > { %495 = vrot.lane.b32.xlu1 %v493_v8, %s1092_s25 }
  0xdf   : > { %516 = vperm.xlu1 %867, %v485_v6  }
  0xe3   : > { %868 = vset.pattern.permute.xlu1 %v1093_v9 }
  0xe4   : > { %527 = vperm.xlu1 %868, %v486_v7  }
  0xe8   : > { %536 = vperm.xlu1 %868, %v485_v6  }
  0xec   : > { %v398_v10 = vpop.xlane.xlu0 %397  ;;  %869 = vset.pattern.permute.xlu1 %v1091_v4  ;;  %v358_v4 = vsub.s32 0, %v357_v34 }
  0xed   : > { %v399_v11 = vsub.f32 %v344_v0, %v398_v10 }
  0xee   : > { %v359_v10 = vrot.slane %v346_v29, %v358_v4 }
  0xef   : > { %v400_v12 = vmul.f32 1.442695, %v399_v11  ;;  %v369_v11 = vrot.slane %v346_v29, %v368_v5 }
  0xf1   : > { %874 = vpow2.f32 %v400_v12 }
  0xfe   : > { %v875_v13 = vpop.eup %874 }
  0xff   : > { %v402_v14 = vsel %vm395_vm0, %v875_v13, 0.0 }
 0x100   : > { %403 = vadd.xlane.f32.xlu0 %v402_v14 }
 0x116   : > { %506 = vperm.xlu0 %866, %v486_v7  }
 0x14d   : > { %v496_v20 = vpop.permute.xlu1 %495 }
 0x14e   : > { %v498_v21 = vmul.f32 %v496_v20, %v493_v8  ;;  %v379_v8 = vsub.s32 2, %v357_v34  ;;  %v391_v20 = vrot.slane %v346_v29, %v390_v16 }
 0x150   : > { %549 = vperm.xlu1 %869, %v498_v21   ;;  %v380_v12 = vrot.slane %v346_v29, %v379_v8 }
 0x154   : > { %870 = vset.pattern.permute.xlu1 %v1096_v22 }
 0x155   : > { %353 = vperm.xlu1 %870, %v345_v1  }
 0x159   : > { %871 = vset.pattern.permute.xlu1 %v1097_v23 }
 0x15a   : > { %363 = vperm.xlu1 %871, %v345_v1   ;;  %v517_v32 = vpop.permute.xlu1 %516 }
 0x15b   : > { %v523_v48 = vmax.f32 %v517_v32, %v522_v41  ;;  %v561_v60 = vmin.f32 %v517_v32, %v522_v41 }
 0x15e   : > { %872 = vset.pattern.permute.xlu1 %v1098_v24 }
 0x15f   : > { %374 = vperm.xlu1 %872, %v345_v1   ;;  %v528_v37 = vpop.permute.xlu1 %527 }
 0x160   : > { %v534_v49 = vmin.f32 %v528_v37, %v533_v42  ;;  %v563_v61 = vmax.f32 %v528_v37, %v533_v42 }
 0x163   : > { %873 = vset.pattern.permute.xlu1 %v1099_v25  ;;  %v537_v45 = vpop.permute.xlu1 %536 }
 0x164   : > { %385 = vperm.xlu1 %873, %v345_v1   ;;  %v543_v50 = vmax.f32 %v537_v45, %v542_v43  ;;  %v564_v62 = vmin.f32 %v537_v45, %v542_v43 }
 0x166   : > { %v544_v52 = vsub.f32 %v534_v49, %v543_v50  ;;  %v565_v2 = vsub.f32 %v563_v61, %v564_v62 }
 0x168   : > { %v545_v56 = vmax.f32 %v544_v52, 0.0 }
 0x189   : > { %v404_v26 = vpop.xlane.xlu0 %403 }
 0x18a   : > { %876 = vrcp.f32 %v404_v26 }
 0x191   : > { %v507_v46 = vpop.permute.xlu0 %506 }
 0x192   : > { %v513_v51 = vmin.f32 %v507_v46, %v512_v44  ;;  %v560_v63 = vmax.f32 %v507_v46, %v512_v44 }
 0x194   : > { %v524_v53 = vsub.f32 %v513_v51, %v523_v48  ;;  %v562_v3 = vsub.f32 %v560_v63, %v561_v60 }
 0x196   : > { %v525_v57 = vmax.f32 %v524_v53, 0.0  ;;  %v566_v9 = vmul.f32 %v565_v2, %v562_v3 }
 0x197   : > { %v877_v27 = vpop.eup %876 }
 0x198   : > { %v406_v28 = vmul.f32 %v877_v27, %v875_v13  ;;  %v546_v0 = vmul.f32 %v545_v56, %v525_v57 }
 0x19a   : > { %775 = vmatmul.mubr.msk.f32.vlgmr.msra.gmra.mxu0 %vm395_vm0, %v406_v28 }
 0x1cb   : > { %v550_v55 = vpop.permute.xlu1 %549 }
 0x1cc   : > { %v556_v1 = vadd.f32 %v555_v58, %v550_v55 }
 0x1ce   : > { %v557_v7 = vsub.f32 %v556_v1, %v546_v0 }
 0x1d0   : > { %v354_v59 = vpop.permute.xlu1 %353  ;;  %878 = vrcp.f32 %v557_v7  ;;  %v567_v26 = vsub.f32 %v566_v9, %v557_v7 }
 0x1d1   : > { %880 = vrcp.f32 %v566_v9  ;;  %v360_v14 = vsub.f32 %v354_v59, %v359_v10 }
 0x1d3   : > { %v361_v17 = vand.u32 2147483647, %v360_v14 }
 0x1d5   : > { %v364_v6 = vpop.permute.xlu1 %363 }
 0x1d6   : > { %v370_v15 = vsub.f32 %v364_v6, %v369_v11 }
 0x1d8   : > { %v371_v18 = vand.u32 2147483647, %v370_v15 }
 0x1da   : > { %v375_v13 = vpop.permute.xlu1 %374  ;;  %v372_v22 = vadd.f32 %v371_v18, %v361_v17 }
 0x1db   : > { %v381_v19 = vsub.f32 %v375_v13, %v380_v12 }
 0x1dd   : > { %v382_v23 = vand.u32 2147483647, %v381_v19  ;;  %v879_v25 = vpop.eup %878 }
 0x1de   : > { %v881_v30 = vpop.eup %880  ;;  %v559_v31 = vmul.f32 %v879_v25, %v546_v0 }
 0x1df   : > { %v386_v21 = vpop.permute.xlu1 %385  ;;  %v383_v27 = vadd.f32 %v382_v23, %v372_v22  ;;  %v569_v33 = vmul.f32 %v881_v30, %v567_v26 }
 0x1e0   : > { %v392_v24 = vsub.f32 %v386_v21, %v391_v20 }
 0x1e1   : > { %v570_v35 = vsub.f32 %v559_v31, %v569_v33 }
 0x1e2   : > { %v393_v28 = vand.u32 2147483647, %v392_v24 }
 0x1e4   : > { %v394_v32 = vadd.f32 %v393_v28, %v383_v27 }
 0x25a   : > { %v476_v34 = vpop.f32.mrf.mxu0 }
 0x25b   : > { %v571_v29 = vadd.f32 %v476_v34, %v394_v32 }
 0x25c   : > { %v776_v36 = vpop.f32.mrf.mxu0 }
 0x25d   : > { %v572_v37 = vsub.f32 %v571_v29, %v570_v35 }
 0x25f   : > { %573 = vst [vmem:[%s343_s17] sm:$0xff] %v572_v37 }
 0x260   : > { %1007 = shalt.err (!%p1004_p13)
}
 0x261   : > { %s1008_s6 = scalar_lea.hbm %s587_s29, 128  ;;  %s1012_s9 = scalar_lea.hbm %s1356_s4, 256 }
 0x262   : > { %p1009_p12 = scmp.ne.s32.totalorder %s587_s29, %s1008_s6  ;;  %p1013_p5 = scmp.lt.s32.totalorder %s587_s29, %s1356_s4 }
 0x263   : > { %p1014_p6 = scmp.lt.s32.totalorder %s1012_s9, %s1008_s6 }
 0x264   : > { %p1010_p1 = pnand %p1009_p12, %p1181_p9 }
 0x265   : > { %p1015_p8 = por %p1014_p6, %p1013_p5 }
 0x266   : > { %p1011_p2 = pneg %p1010_p1 }
 0x268   : > { %p1016_p0 = pnand %p1015_p8, %p1011_p2 }
 0x26a   : > { %1019 = shalt.err (!%p1016_p0)
}
 0x26b   : > { %785 = dma.vmem_to_hbm [thread:$0]  (%p1181_p9), %s590_s20, 128, %s587_s29, %s575_s23  }
 0x26c PF: > { %s1373_s12 = sld [smem:[#allocation16_spill]]  ;;  %s601_s14 = sand.u32 1, %s1062_s15  }
 0x26d   : > { %s602_s1 = scalar_lea.sflag [#allocation4], %s601_s14 }
 0x272   : > { %p1374_p3 = scmp.ge.s32.totalorder %s1373_s12, 2 }
 0x274   : > { %p801_p4 = pnand %p1374_p3, %p1188_p11 }
 0x276   : > { %p802_p7 = pneg %p801_p4 }
 0x278   : > { %1057 = dma.done.wait (%p802_p7), %s602_s1, 128  }
 0x279   : > { %1059 = vsyncadd (%p802_p7), %s602_s1, 4294967168  ;;  %s26_s20 = sadd.s32 1, %s1373_s12   ;;  %s1375_s21 = sld [smem:[#allocation15_spill]] }
 0x27a   : > { %p23_p10 = scmp.ge.s32.totalorder %s26_s20, 4   ;;  %s1376_s17 = sld [smem:[#allocation18_spill]] }
 0x27b   : > { %s1377_s28 = sld [smem:[#allocation17_spill]]  ;;  %s1378_s15 = smov %s1066_s16 }
 0x27c   : > { %s1380_s18 = smov %s1078_s19 }
 0x27d   :  { %25 = sbr.rel (!%p23_p10) target bundleno = 12 (0xc), region = 118 }
 0x27f   : > { %s1379_s16 = smov %s1375_s21 }
 0x281   : > { %s1381_s19 = smov %s1377_s28 }
 0x282   :  { %607 = vsyncpa [#allocation3], 1 }
 0x283   :  { %609 = vsyncpa [#allocation3 + $0x1], 1 }
 0x284   :  { %610 = vsyncpa [#allocation6], 1 }
 0x285   :  { %612 = vsyncpa [#allocation6 + $0x1], 1 }
 0x286   :  { %613 = vsyncpa [#allocation9], 1 }
 0x287   :  { %615 = vsyncpa [#allocation9 + $0x1], 1 }
 0x288   :  { %616 = vsyncpa [#allocation4], 1 }
 0x289   :  { %618 = vsyncpa [#allocation4 + $0x1], 1 }

</bundles_post_ra>
